<compile_context>
chip_gen: v6e
topology: v6e:2x2x1
jax: 0.10.0
libtpu: 0.0.40
codegen_flags: <defaults>
</compile_context>

<pallas_src>
import functools
import math

import jax
import jax.numpy as jnp
from jax.experimental import pallas as pl
from jax.experimental.pallas import tpu as pltpu


def _round_up(x, m):
    return ((x + m - 1) // m) * m


def _pick_bt(B, C_out, L_conv, bt):
    """Choose the batch tile so bt*C_out fills the MXU rows but the grid keeps >=2 steps."""
    if bt is None:
        bt = max(1, math.ceil(256 / max(C_out, 1)))     # bt*C_out >= 256 (v6e/v7x MXU rows)
        if bt >= B and B > 1:
            bt = math.ceil(B / 2)                       # keep 2 grid steps -> both TensorCores
    bt = max(1, min(bt, B))
    # Sublane alignment of the streamed patch block (bt*L_conv rows) and output block
    # (bt*C_out rows): both must be multiples of 8 for clean (8,128) blocking.
    align = math.lcm(8 // math.gcd(L_conv, 8), 8 // math.gcd(C_out, 8))
    return _round_up(bt, align)


def convblock_kernel(p_ref, w2t_ref, bc_ref, wlt_ref, lnp_ref, wst_ref, bs_ref,
                     o_ref, *, bt, c_out, l_conv, out_dim, eps):
    """One batch block (bt elements) per grid step.

    p_ref   : (bt*L_conv, C_in*K)   bf16 im2col patches, rows=(b,l), cols=(k,ci)
    w2t_ref : (C_in*K, C_out)       bf16 conv weight, rows=(k,ci)          [VMEM resident]
    bc_ref  : (1, C_out)            f32 conv bias                           [VMEM resident]
    wlt_ref : (L_conv, Dp)          bf16 linear weight^T, zero-padded cols  [VMEM resident]
    lnp_ref : (3, Dp)               f32 [linear bias; ln gamma; ln beta]    [VMEM resident]
    wst_ref : (Dp, 2*Dp)            bf16 SwiGLU weight^T, zero-padded       [VMEM resident]
    bs_ref  : (1, 2*Dp)             f32 SwiGLU bias, zero-padded            [VMEM resident]
    o_ref   : (bt*C_out, Dp)        bf16 output (padded columns are exactly zero)
    """
    dp = wlt_ref.shape[1]

    # --- Conv1d: a single im2col matmul, batch folded into M = bt*L_conv ---
    conv_t = jnp.dot(p_ref[...], w2t_ref[...],
                     preferred_element_type=jnp.float32)        # (bt*L_conv, C_out) f32
    conv_t = conv_t + bc_ref[...]                               # conv bias: one broadcast add

    # Reorder (b, l, c) -> (b, c, l).  Leading-dim reshapes are layout-preserving; the
    # minor-2D transpose is one XLU pass over a tiny f32 tile (kept f32 for robust lowering).
    conv = conv_t.reshape(bt, l_conv, c_out)
    conv = jnp.swapaxes(conv, 1, 2).reshape(bt * c_out, l_conv)
    conv = conv.astype(jnp.bfloat16)

    # --- Linear(in_dim=L_conv, out_dim): M = bt*C_out fills the MXU rows ---
    h = jnp.dot(conv, wlt_ref[...],
                preferred_element_type=jnp.float32)             # (bt*C_out, Dp) f32
    h = h + lnp_ref[0:1, :]                                     # linear bias (padded cols stay 0)

    # --- LayerNorm over the true out_dim (two-pass; padded columns of h are exactly 0) ---
    inv_n = 1.0 / out_dim
    mean = jnp.sum(h, axis=-1, keepdims=True) * inv_n
    xc = h - mean
    if dp != out_dim:
        mask = (jax.lax.broadcasted_iota(jnp.int32, (1, dp), 1)
                < out_dim).astype(jnp.float32)
        xc = xc * mask
    var = jnp.sum(xc * xc, axis=-1, keepdims=True) * inv_n
    hn = xc * jax.lax.rsqrt(var + eps)
    hn = hn * lnp_ref[1:2, :] + lnp_ref[2:3, :]                 # gamma / beta (padded cols -> 0)

    # --- SwiGLU: a * silu(g), [a | g] split at the lane-aligned Dp boundary ---
    z = jnp.dot(hn.astype(jnp.bfloat16), wst_ref[...],
                preferred_element_type=jnp.float32) + bs_ref[...]   # (bt*C_out, 2*Dp)
    a = z[:, :dp]
    g = z[:, dp:]
    out = a * (g * jax.nn.sigmoid(g))                           # f32 elementwise (VPU/EUP)

    # --- Dropout(p=0) == identity; flat lane-dense bf16 store ---
    o_ref[...] = out.astype(o_ref.dtype)


def convblock_forward(x, params, *, bt=None, out_dtype=jnp.bfloat16):
    """x: (B, C_in, L_in) float32; params: dict (see make_params). Returns (B, C_out, out_dim)."""
    B, C_in, L_in = x.shape
    wc = params["conv_w"]                                       # (C_out, C_in, K)
    C_out, _, K = wc.shape
    pad = params["padding"]
    out_dim, in_dim = params["lin_w"].shape
    L_conv = L_in + 2 * pad - K + 1
    assert in_dim == L_conv, (
        f"Linear in_dim ({in_dim}) must equal conv output length ({L_conv})")

    CK = C_in * K
    Dp = _round_up(out_dim, 128)                                # lane-dense output width
    bt = _pick_bt(B, C_out, L_conv, bt)
    Bp = _round_up(B, bt)

    # --- glue: im2col patches rows=(b,l) cols=(k,ci); zero padding folded in; bf16 casts ---
    xpad = jnp.pad(x, ((0, 0), (0, 0), (pad, pad)))
    cols = jnp.stack([xpad[:, :, k:k + L_conv] for k in range(K)], axis=1)  # (B,K,C_in,L_conv)
    patches = cols.transpose(0, 3, 1, 2).reshape(B * L_conv, CK)            # rows=(b,l)
    if Bp != B:
        patches = jnp.pad(patches, ((0, (Bp - B) * L_conv), (0, 0)))
    patches = patches.astype(jnp.bfloat16)

    w2t = wc.transpose(2, 1, 0).reshape(CK, C_out).astype(jnp.bfloat16)     # rows=(k,ci)
    bc = params["conv_b"].reshape(1, C_out).astype(jnp.float32)

    wlt = jnp.pad(params["lin_w"].T,
                  ((0, 0), (0, Dp - out_dim))).astype(jnp.bfloat16)         # (L_conv, Dp)
    lnp = jnp.stack([jnp.pad(params["lin_b"], (0, Dp - out_dim)),
                     jnp.pad(params["ln_g"], (0, Dp - out_dim)),
                     jnp.pad(params["ln_b"], (0, Dp - out_dim))],
                    axis=0).astype(jnp.float32)                             # (3, Dp)

    ws = params["swiglu_w"]                                     # (2*out_dim, out_dim)
    wa, wg = ws[:out_dim].T, ws[out_dim:].T
    wst = jnp.zeros((Dp, 2 * Dp), jnp.float32)
    wst = wst.at[:out_dim, :out_dim].set(wa)
    wst = wst.at[:out_dim, Dp:Dp + out_dim].set(wg)
    wst = wst.astype(jnp.bfloat16)                              # (Dp, 2*Dp)
    bs = jnp.zeros((2 * Dp,), jnp.float32)
    bs = bs.at[:out_dim].set(params["swiglu_b"][:out_dim])
    bs = bs.at[Dp:Dp + out_dim].set(params["swiglu_b"][out_dim:])
    bs = bs.reshape(1, 2 * Dp)

    kernel = functools.partial(convblock_kernel, bt=bt, c_out=C_out, l_conv=L_conv,
                               out_dim=out_dim, eps=1e-5)

    # Grid-invariant weights: whole-array VMEM residency (single-buffered).
    resident = pl.BlockSpec(memory_space=pltpu.MemorySpace.VMEM)

    # VMEM budget: 2x streamed blocks (in/out) + resident weights + f32 temporaries,
    # with 2x headroom; capped at 48 MiB so the same value is safe on v7x (64 MiB VMEM).
    out_isize = jnp.dtype(out_dtype).itemsize
    blk_in = bt * L_conv * _round_up(CK, 128) * 2
    blk_out = bt * C_out * Dp * out_isize
    weights = (CK * C_out + L_conv * Dp + Dp * 2 * Dp) * 2 + (3 * Dp + 2 * Dp + C_out) * 4
    temps = bt * C_out * (2 * Dp) * 4 * 3
    vmem_budget = int(min(48 * 2**20,
                          max(32 * 2**20, 2 * (2 * blk_in + 2 * blk_out + weights + temps))))

    out = pl.pallas_call(
        kernel,
        out_shape=jax.ShapeDtypeStruct((Bp * C_out, Dp), out_dtype),
        grid=(Bp // bt,),
        in_specs=[
            pl.BlockSpec((bt * L_conv, CK), lambda i: (i, 0)),   # patches (batch-blocked)
            resident,                                            # conv weight^T
            resident,                                            # conv bias
            resident,                                            # linear weight^T
            resident,                                            # [lin bias; gamma; beta]
            resident,                                            # swiglu weight^T
            resident,                                            # swiglu bias
        ],
        out_specs=pl.BlockSpec((bt * C_out, Dp), lambda i: (i, 0)),
        compiler_params=pltpu.CompilerParams(
            dimension_semantics=("parallel",),        # batch blocks split across TensorCores
            vmem_limit_bytes=vmem_budget,
        ),
    )(patches, w2t, bc, wlt, lnp, wst, bs)

    return out.reshape(Bp, C_out, Dp)[:B, :, :out_dim]


def make_params(key, in_channels, out_channels, in_dim, out_dim, kernel_size, padding):
    ks = jax.random.split(key, 6)
    scale = 0.1
    return {
        "conv_w": scale * jax.random.normal(ks[0], (out_channels, in_channels, kernel_size), jnp.float32),
        "conv_b": scale * jax.random.normal(ks[1], (out_channels,), jnp.float32),
        "lin_w": scale * jax.random.normal(ks[2], (out_dim, in_dim), jnp.float32),
        "lin_b": scale * jax.random.normal(ks[3], (out_dim,), jnp.float32),
        "ln_g": jnp.ones((out_dim,), jnp.float32),
        "ln_b": jnp.zeros((out_dim,), jnp.float32),
        "swiglu_w": scale * jax.random.normal(ks[4], (2 * out_dim, out_dim), jnp.float32),
        "swiglu_b": scale * jax.random.normal(ks[5], (2 * out_dim,), jnp.float32),
        "padding": padding,
    }


def reference_forward(x, params):
    """Pure-JAX f32 reference matching the PyTorch module semantics."""
    pad = params["padding"]
    xp = jnp.pad(x, ((0, 0), (0, 0), (pad, pad)))
    wc, bc = params["conv_w"], params["conv_b"]
    K = wc.shape[2]
    L_conv = x.shape[2] + 2 * pad - K + 1
    conv = sum(jnp.einsum("oi,bil->bol", wc[:, :, k], xp[:, :, k:k + L_conv])
               for k in range(K)) + bc[None, :, None]
    h = conv @ params["lin_w"].T + params["lin_b"]
    mean = h.mean(-1, keepdims=True)
    var = ((h - mean) ** 2).mean(-1, keepdims=True)
    hn = (h - mean) * jax.lax.rsqrt(var + 1e-5) * params["ln_g"] + params["ln_b"]
    z = hn @ params["swiglu_w"].T + params["swiglu_b"]
    d = z.shape[-1] // 2
    a, g = z[..., :d], z[..., d:]
    return a * (g * jax.nn.sigmoid(g))


if __name__ == "__main__":
    # Small shapes consistent with the module: Conv1d expects (B, C_in, L); "same" conv
    # (2*pad == K-1) so L == in_dim as the Linear requires.  B=32 so the auto batch tile
    # picks bt=16 -> grid=(2,) (both TensorCores) with M = bt*C_out = 128 per matmul.
    B, C_in, C_out = 32, 4, 8
    in_dim, out_dim = 16, 32
    kernel_size, padding = 3, 1

    key = jax.random.PRNGKey(0)
    kx, kp = jax.random.split(key)
    x = jax.random.normal(kx, (B, C_in, in_dim), jnp.float32)
    params = make_params(kp, C_in, C_out, in_dim, out_dim, kernel_size, padding)

    out = convblock_forward(x, params)          # auto bt
    out = jax.block_until_ready(out)

    ref = reference_forward(x, params)
    assert out.shape == (B, C_out, out_dim), out.shape
    # bf16 MXU operands + bf16 output writeback -> loose tolerance vs the pure-f32 reference.
    max_err = float(jnp.max(jnp.abs(out.astype(jnp.float32) - ref)))
    assert max_err < 5e-2, max_err

    print("KERNEL_OK")
</pallas_src>

<mosaic_0001>
module attributes {stable_mosaic.version = 11 : i64} {
  func.func @convblock_kernel(%arg0: i32, %arg1: memref<256x12xbf16, #tpu.memory_space<vmem>>, %arg2: memref<12x8xbf16, #tpu.memory_space<vmem>>, %arg3: memref<1x8xf32, #tpu.memory_space<vmem>>, %arg4: memref<16x128xbf16, #tpu.memory_space<vmem>>, %arg5: memref<3x128xf32, #tpu.memory_space<vmem>>, %arg6: memref<128x256xbf16, #tpu.memory_space<vmem>>, %arg7: memref<1x256xf32, #tpu.memory_space<vmem>>, %arg8: memref<128x128xbf16, #tpu.memory_space<vmem>>) attributes {dimension_semantics = [#tpu.dimension_semantics<parallel>], iteration_bounds = array<i64: 2>, scalar_prefetch = 0 : i64, scratch_operands = 0 : i64, tpu.core_type = #tpu.core_type<tc>, window_params = [{transform_indices = @transform_0, window_bounds = array<i64: 256, 12>}, {pipeline_mode = #tpu.pipeline_mode<synchronous>, transform_indices = @transform_1, window_bounds = array<i64: 12, 8>}, {pipeline_mode = #tpu.pipeline_mode<synchronous>, transform_indices = @transform_2, window_bounds = array<i64: 1, 8>}, {pipeline_mode = #tpu.pipeline_mode<synchronous>, transform_indices = @transform_3, window_bounds = array<i64: 16, 128>}, {pipeline_mode = #tpu.pipeline_mode<synchronous>, transform_indices = @transform_4, window_bounds = array<i64: 3, 128>}, {pipeline_mode = #tpu.pipeline_mode<synchronous>, transform_indices = @transform_5, window_bounds = array<i64: 128, 256>}, {pipeline_mode = #tpu.pipeline_mode<synchronous>, transform_indices = @transform_6, window_bounds = array<i64: 1, 256>}, {transform_indices = @transform_7, window_bounds = array<i64: 128, 128>}]} {
    %c0 = arith.constant 0 : index
    %c0_0 = arith.constant 0 : index
    %0 = vector.load %arg1[%c0, %c0_0] : memref<256x12xbf16, #tpu.memory_space<vmem>>, vector<256x12xbf16>
    %c0_1 = arith.constant 0 : index
    %c0_2 = arith.constant 0 : index
    %1 = vector.load %arg2[%c0_1, %c0_2] : memref<12x8xbf16, #tpu.memory_space<vmem>>, vector<12x8xbf16>
    %cst = arith.constant dense<0.000000e+00> : vector<256x8xf32>
    %2 = tpu.matmul %0, %1, %cst {dimension_numbers = #tpu.dot_dimension_numbers<[1], [0], [0], [1], [0, 0, 1, 1], [], []>} : vector<256x12xbf16>, vector<12x8xbf16>, vector<256x8xf32> -> vector<256x8xf32>
    %c0_3 = arith.constant 0 : index
    %c0_4 = arith.constant 0 : index
    %3 = vector.load %arg3[%c0_3, %c0_4] : memref<1x8xf32, #tpu.memory_space<vmem>>, vector<1x8xf32>
    %4 = vector.broadcast %3 : vector<1x8xf32> to vector<256x8xf32>
    %5 = arith.addf %2, %4 : vector<256x8xf32>
    %6 = vector.shape_cast %5 : vector<256x8xf32> to vector<16x16x8xf32>
    %7 = tpu.transpose %6, [0, 2, 1] : vector<16x16x8xf32> -> vector<16x8x16xf32>
    %8 = vector.shape_cast %7 : vector<16x8x16xf32> to vector<128x16xf32>
    %9 = arith.truncf %8 : vector<128x16xf32> to vector<128x16xbf16>
    %c0_5 = arith.constant 0 : index
    %c0_6 = arith.constant 0 : index
    %10 = vector.load %arg4[%c0_5, %c0_6] : memref<16x128xbf16, #tpu.memory_space<vmem>>, vector<16x128xbf16>
    %cst_7 = arith.constant dense<0.000000e+00> : vector<128x128xf32>
    %11 = tpu.matmul %9, %10, %cst_7 {dimension_numbers = #tpu.dot_dimension_numbers<[1], [0], [0], [1], [0, 0, 1, 1], [], []>} : vector<128x16xbf16>, vector<16x128xbf16>, vector<128x128xf32> -> vector<128x128xf32>
    %c0_8 = arith.constant 0 : index
    %c0_9 = arith.constant 0 : index
    %12 = vector.load %arg5[%c0_8, %c0_9] : memref<3x128xf32, #tpu.memory_space<vmem>>, vector<1x128xf32>
    %13 = vector.broadcast %12 : vector<1x128xf32> to vector<128x128xf32>
    %14 = arith.addf %11, %13 : vector<128x128xf32>
    %cst_10 = arith.constant dense<0.000000e+00> : vector<128xf32>
    %15 = vector.multi_reduction <add>, %14, %cst_10 [1] : vector<128x128xf32> to vector<128xf32>
    %16 = vector.shape_cast %15 : vector<128xf32> to vector<128x1xf32>
    %cst_11 = arith.constant 3.125000e-02 : f32
    %17 = vector.broadcast %cst_11 : f32 to vector<128x1xf32>
    %18 = arith.mulf %16, %17 : vector<128x1xf32>
    %19 = vector.broadcast %18 : vector<128x1xf32> to vector<128x128xf32>
    %20 = arith.subf %14, %19 : vector<128x128xf32>
    %21 = tpu.iota {dimensions = array<i32: 1>} : vector<1x128xi32>
    %c32_i32 = arith.constant 32 : i32
    %22 = vector.broadcast %c32_i32 : i32 to vector<1x128xi32>
    %23 = arith.cmpi slt, %21, %22 : vector<1x128xi32>
    %24 = arith.extui %23 : vector<1x128xi1> to vector<1x128xi32>
    %25 = arith.sitofp %24 : vector<1x128xi32> to vector<1x128xf32>
    %26 = vector.broadcast %25 : vector<1x128xf32> to vector<128x128xf32>
    %27 = arith.mulf %20, %26 : vector<128x128xf32>
    %28 = arith.mulf %27, %27 : vector<128x128xf32>
    %cst_12 = arith.constant dense<0.000000e+00> : vector<128xf32>
    %29 = vector.multi_reduction <add>, %28, %cst_12 [1] : vector<128x128xf32> to vector<128xf32>
    %30 = vector.shape_cast %29 : vector<128xf32> to vector<128x1xf32>
    %cst_13 = arith.constant 3.125000e-02 : f32
    %31 = vector.broadcast %cst_13 : f32 to vector<128x1xf32>
    %32 = arith.mulf %30, %31 : vector<128x1xf32>
    %cst_14 = arith.constant 9.99999974E-6 : f32
    %33 = vector.broadcast %cst_14 : f32 to vector<128x1xf32>
    %34 = arith.addf %32, %33 : vector<128x1xf32>
    %35 = math.rsqrt %34 : vector<128x1xf32>
    %36 = vector.broadcast %35 : vector<128x1xf32> to vector<128x128xf32>
    %37 = arith.mulf %27, %36 : vector<128x128xf32>
    %c1 = arith.constant 1 : index
    %c0_15 = arith.constant 0 : index
    %38 = vector.load %arg5[%c1, %c0_15] : memref<3x128xf32, #tpu.memory_space<vmem>>, vector<1x128xf32>
    %39 = vector.broadcast %38 : vector<1x128xf32> to vector<128x128xf32>
    %40 = arith.mulf %37, %39 : vector<128x128xf32>
    %c2 = arith.constant 2 : index
    %c0_16 = arith.constant 0 : index
    %41 = vector.load %arg5[%c2, %c0_16] : memref<3x128xf32, #tpu.memory_space<vmem>>, vector<1x128xf32>
    %42 = vector.broadcast %41 : vector<1x128xf32> to vector<128x128xf32>
    %43 = arith.addf %40, %42 : vector<128x128xf32>
    %44 = arith.truncf %43 : vector<128x128xf32> to vector<128x128xbf16>
    %c0_17 = arith.constant 0 : index
    %c0_18 = arith.constant 0 : index
    %45 = vector.load %arg6[%c0_17, %c0_18] : memref<128x256xbf16, #tpu.memory_space<vmem>>, vector<128x256xbf16>
    %cst_19 = arith.constant dense<0.000000e+00> : vector<128x256xf32>
    %46 = tpu.matmul %44, %45, %cst_19 {dimension_numbers = #tpu.dot_dimension_numbers<[1], [0], [0], [1], [0, 0, 1, 1], [], []>} : vector<128x128xbf16>, vector<128x256xbf16>, vector<128x256xf32> -> vector<128x256xf32>
    %c0_20 = arith.constant 0 : index
    %c0_21 = arith.constant 0 : index
    %47 = vector.load %arg7[%c0_20, %c0_21] : memref<1x256xf32, #tpu.memory_space<vmem>>, vector<1x256xf32>
    %48 = vector.broadcast %47 : vector<1x256xf32> to vector<128x256xf32>
    %49 = arith.addf %46, %48 : vector<128x256xf32>
    %50 = vector.extract_strided_slice %49 {offsets = [0, 0], sizes = [128, 128], strides = [1, 1]} : vector<128x256xf32> to vector<128x128xf32>
    %51 = vector.extract_strided_slice %49 {offsets = [0, 128], sizes = [128, 128], strides = [1, 1]} : vector<128x256xf32> to vector<128x128xf32>
    %52 = arith.negf %51 : vector<128x128xf32>
    %53 = math.exp %52 : vector<128x128xf32>
    %cst_22 = arith.constant 1.000000e+00 : f32
    %54 = vector.broadcast %cst_22 : f32 to vector<128x128xf32>
    %55 = arith.addf %54, %53 : vector<128x128xf32>
    %56 = arith.divf %54, %55 : vector<128x128xf32>
    %57 = arith.mulf %51, %56 : vector<128x128xf32>
    %58 = arith.mulf %50, %57 : vector<128x128xf32>
    %59 = arith.truncf %58 : vector<128x128xf32> to vector<128x128xbf16>
    %c0_23 = arith.constant 0 : index
    %c0_24 = arith.constant 0 : index
    %60 = vector.load %arg8[%c0_23, %c0_24] : memref<128x128xbf16, #tpu.memory_space<vmem>>, vector<128x128xbf16>
    tpu.vector_store %arg8[%c0_23, %c0_24], %59 {strides = array<i32>} : memref<128x128xbf16, #tpu.memory_space<vmem>>, vector<128x128xbf16>,
    return
  }
  func.func @transform_0(%arg0: i32) -> (i32, i32) {
    %c0_i32 = arith.constant 0 : i32
    %c0_i32_0 = arith.constant 0 : i32
    return %arg0, %c0_i32 : i32, i32
  }
  func.func @transform_1(%arg0: i32) -> (i32, i32) {
    %c0_i32 = arith.constant 0 : i32
    %c0_i32_0 = arith.constant 0 : i32
    %c0_i32_1 = arith.constant 0 : i32
    return %c0_i32, %c0_i32_0 : i32, i32
  }
  func.func @transform_2(%arg0: i32) -> (i32, i32) {
    %c0_i32 = arith.constant 0 : i32
    %c0_i32_0 = arith.constant 0 : i32
    %c0_i32_1 = arith.constant 0 : i32
    return %c0_i32, %c0_i32_0 : i32, i32
  }
  func.func @transform_3(%arg0: i32) -> (i32, i32) {
    %c0_i32 = arith.constant 0 : i32
    %c0_i32_0 = arith.constant 0 : i32
    %c0_i32_1 = arith.constant 0 : i32
    return %c0_i32, %c0_i32_0 : i32, i32
  }
  func.func @transform_4(%arg0: i32) -> (i32, i32) {
    %c0_i32 = arith.constant 0 : i32
    %c0_i32_0 = arith.constant 0 : i32
    %c0_i32_1 = arith.constant 0 : i32
    return %c0_i32, %c0_i32_0 : i32, i32
  }
  func.func @transform_5(%arg0: i32) -> (i32, i32) {
    %c0_i32 = arith.constant 0 : i32
    %c0_i32_0 = arith.constant 0 : i32
    %c0_i32_1 = arith.constant 0 : i32
    return %c0_i32, %c0_i32_0 : i32, i32
  }
  func.func @transform_6(%arg0: i32) -> (i32, i32) {
    %c0_i32 = arith.constant 0 : i32
    %c0_i32_0 = arith.constant 0 : i32
    %c0_i32_1 = arith.constant 0 : i32
    return %c0_i32, %c0_i32_0 : i32, i32
  }
  func.func @transform_7(%arg0: i32) -> (i32, i32) {
    %c0_i32 = arith.constant 0 : i32
    %c0_i32_0 = arith.constant 0 : i32
    return %arg0, %c0_i32 : i32, i32
  }
}

</mosaic_0001>

<bundles_post_ra>
// kernel: tpu_custom_call.1
= control target key start
LH: loop header
LB: loop body
LE: loop exit
PB: predicated region body
PF: predicated region fallthrough
CT: control target
= control target key end

     0   :  { %12 = vsyncpa [#allocation3], 0  ;;  %s3271_s0 = inlined_call_operand.vmem [shape: bf16[512,12], index: 0, kind: input, shape index: {}]   ;;  %s3272_s1 = inlined_call_operand.vmem [shape: bf16[12,8], index: 1, kind: input, shape index: {}]   ;;  %s3273_s2 = inlined_call_operand.vmem [shape: f32[1,8], index: 2, kind: input, shape index: {}]   ;;  %s3274_s3 = inlined_call_operand.vmem [shape: bf16[16,128], index: 3, kind: input, shape index: {}]   ;;  %s3275_s4 = inlined_call_operand.vmem [shape: f32[3,128], index: 4, kind: input, shape index: {}]   ;;  %s3276_s5 = inlined_call_operand.vmem [shape: bf16[128,256], index: 5, kind: input, shape index: {}]   ;;  %s3277_s6 = inlined_call_operand.vmem [shape: f32[1,256], index: 6, kind: input, shape index: {}]   ;;  %s3278_s7 = inlined_call_operand.hbm [shape: bf16[256,128], index: 7, kind: output, shape index: {}]  }
   0x1   :  { %14 = vsyncpa [#allocation3 + $0x1], 0  ;;  %s2654_s24 = smov 0   ;;  %s2656_s25 = smov 0  }
   0x2   :  { %s2658_s26 = smov 0   ;;  %s2660_s27 = smov 0  }
   0x3 LB: > { %s2675_s28 = sadd.s32 4294967295, %s2607_s27   ;;  %s2028_s29 = sadd.s32 4294967294, %s2607_s27   ;;  %s2607_s27 = sphi %s2660_s27, %s3284_s27   ;;  %s2603_s26 = sphi %s2658_s26, %s3283_s26   ;;  %s2599_s25 = sphi %s2656_s25, %s3282_s25   ;;  %s2595_s24 = sphi %s2654_s24, %s3281_s24  }
   0x4   : > { %s2679_s30 = sadd.s32 1, %s2607_s27   ;;  %s179_s8 = sadd.s32 1, %s2603_s26 }
   0x5   : > { %s176_s9 = ssub.s32 %s2607_s27, %s2679_s30  ;;  %p189_p0 = scmp.ne.s32.totalorder %s2603_s26, %s2599_s25 }
   0x6   : > { %p177_p1 = scmp.eq.s32.totalorder %s176_s9, 0  ;;  %p190_p2 = scmp.eq.s32.totalorder %s2675_s28, 1 }
   0x7   : > { %p195_p3 = scmp.ne.s32.totalorder %s2599_s25, %s2595_s24  ;;  %p196_p4 = scmp.eq.s32.totalorder %s2028_s29, 1 }
   0x8   : > { %s2690_s10 = scalar_select %p177_p1, %s2603_s26, %s179_s8  }
   0x9   : > { %p2692_p5 = por %p190_p2, %p189_p0  ;;  %p2696_p6 = por %p196_p4, %p195_p3 }
   0xa   : > { %p2031_p7 = scmp.ge.s32.totalorder %s2607_s27, 1  ;;  %p241_p8 = scmp.lt.s32.totalorder %s2607_s27, 3 }
   0xc   : > { %p242_p9 = pnand %p2031_p7, %p241_p8 }
   0xd   : > { %s2033_s15 = sshll.u32 (!%p242_p9), %s2675_s28, 5  ;;  %s270_s22 = sand.u32 (!%p242_p9), 1, %s2599_s25  }
   0xe   : > { %245 = sbr.rel (%p242_p9) target bundleno = 1181 (0x49d), region = 48  ;;  %p274_p10 = scmp.lt.s32.totalorder (!%p242_p9), %s2033_s15, 63 }
   0xf   : > { %s2032_s23 = sshll.u32 (!%p242_p9), %s270_s22, 6  ;;  %s2151_s8 = sshll.u32 (!%p242_p9), %s2675_s28, 10 }
  0x10   : > { %s3164_s29 = scalar_lea.vmem (!%p242_p9), [#allocation2], %s2032_s23  ;;  %s2611_s17 = smov (!%p242_p9), [#allocation2]  }
  0x11   : > { %s1966_s9 = sshll.u32 (!%p242_p9), %s3164_s29, 4  ;;  %s2551_s18 = sshll.u32 (!%p242_p9), %s2611_s17, 4  ;;  %s3226_s9 = int_to_ptr.vmem [resolvable:$true] %s1966_s9  ;;  %s2552_s18 = int_to_ptr.vmem [resolvable:$false] %s2551_s18 }
  0x12   : > { %s2547_s28 = scalar_lea.vmem (!%p242_p9), %s3226_s9, 1024  ;;  %p2554_p0 = scmp.lt.s32.totalorder (!%p242_p9), %s3226_s9, %s2552_s18 }
  0x13   : > { %v2409_v0 = vld [vmem:[%s3272_s1] sm:$0x3f]   ;;  %vm456_vm0 = vcmask 1045504   ;;  %s3286_s15 = smov (!%p274_p10, %s2033_s15), 63  ;;  %vm407_vm1 = vcmask 97280   ;;  %vm1154_vm2 = vcmask 130048   ;;  %p2548_p11 = scmp.ne.s32.totalorder %s3226_s9, %s2547_s28 }
  0x14   : > { %2293 = vmatprep.subr.msk.bf16.mxu0 %vm456_vm0, %v2409_v0  ;;  %v458_v1 = vsel %vm456_vm0, %v2409_v0, 0  ;;  %s2034_s16 = sshll.u32 %s3286_s15, 2  ;;  %v2746_v19 = vld [vmem:[%s3273_s2] ss:$0 sm:$0xff]  ;;  %s3224_s15 = scalar_lea.hbm %s3278_s7, %s2151_s8 }
  0x15   : > { %2226 = vmatpush3.bf16.msra.mxu0 %v458_v1  ;;  %s2709_s19 = scalar_lea.vmem %s3271_s0, %s2034_s16  ;;  %v2426_v34 = vld [vmem:[%s3274_s3] sm:$0xff]   ;;  %s3231_s16 = scalar_lea.sflag [#allocation3], %s270_s22 }
  0x16   : > { %v2410_v2 = vld [vmem:[%s2709_s19] sm:$0xff]   ;;  %v2411_v3 = vld [vmem:[%s2709_s19 + $0x8] sm:$0xff]   ;;  %v2412_v4 = vld [vmem:[%s2709_s19 + $0x10] sm:$0xff]   ;;  %2259 = vmatprep.subr.bf16.mxu1 %v2426_v34  ;;  %p2549_p12 = pnand %p2548_p11, %p2692_p5 }
  0x17   : > { %2227 = vmatprep.mubr.msk.bf16.mxu0 %vm407_vm1, %v2410_v2  ;;  %v2413_v5 = vld [vmem:[%s2709_s19 + $0x18] sm:$0xff]   ;;  %v2414_v6 = vld [vmem:[%s2709_s19 + $0x20] sm:$0xff]   ;;  %v2415_v7 = vld [vmem:[%s2709_s19 + $0x28] sm:$0xff]   ;;  %2260 = vmatpush3.bf16.msra.mxu1 %v2426_v34 }
  0x18   : > { %2228 = vmatmul.mubr.msk.bf16.vlgmr.msra.gmra.mxu0 %vm407_vm1, %v2411_v3  ;;  %v2416_v8 = vld [vmem:[%s2709_s19 + $0x30] sm:$0xff]   ;;  %v2417_v9 = vld [vmem:[%s2709_s19 + $0x38] sm:$0xff]   ;;  %v2418_v10 = vld [vmem:[%s2709_s19 + $0x40] sm:$0xff]   ;;  %p2550_p13 = pneg %p2549_p12 }
  0x19   : > { %2231 = vmatprep.mubr.msk.bf16.mxu0 %vm407_vm1, %v2412_v4  ;;  %v2419_v11 = vld [vmem:[%s2709_s19 + $0x48] sm:$0xff]   ;;  %v2420_v12 = vld [vmem:[%s2709_s19 + $0x50] sm:$0xff]   ;;  %v2421_v13 = vld [vmem:[%s2709_s19 + $0x58] sm:$0xff]  }
  0x1a   : > { %v2422_v14 = vld [vmem:[%s2709_s19 + $0x60] sm:$0xff]   ;;  %v2423_v15 = vld [vmem:[%s2709_s19 + $0x68] sm:$0xff]   ;;  %v2424_v16 = vld [vmem:[%s2709_s19 + $0x70] sm:$0xff]  }
  0x1b   : > { %v2425_v17 = vld [vmem:[%s2709_s19 + $0x78] sm:$0xff]   ;;  %s2553_s19 = scalar_lea.vmem %s2552_s18, 2048 }
  0x1c   : > { %p2555_p1 = scmp.lt.s32.totalorder %s2553_s19, %s2547_s28 }
  0x1e   : > { %p2556_p2 = por %p2555_p1, %p2554_p0 }
  0x20   : > { %2232 = vmatmul.mubr.msk.bf16.gmra.mxu0 %vm407_vm1, %v2413_v5  ;;  %p2557_p3 = pnand %p2556_p2, %p2550_p13 }
  0x21   : > { %2235 = vmatprep.mubr.msk.bf16.mxu0 %vm407_vm1, %v2414_v6 }
  0x28   : > { %2236 = vmatmul.mubr.msk.bf16.gmra.mxu0 %vm407_vm1, %v2415_v7 }
  0x29   : > { %2239 = vmatprep.mubr.msk.bf16.mxu0 %vm407_vm1, %v2416_v8 }
  0x30   : > { %2240 = vmatmul.mubr.msk.bf16.gmra.mxu0 %vm407_vm1, %v2417_v9 }
  0x31   : > { %2243 = vmatprep.mubr.msk.bf16.mxu0 %vm407_vm1, %v2418_v10 }
  0x38   : > { %2244 = vmatmul.mubr.msk.bf16.gmra.mxu0 %vm407_vm1, %v2419_v11 }
  0x39   : > { %2247 = vmatprep.mubr.msk.bf16.mxu0 %vm407_vm1, %v2420_v12 }
  0x40   : > { %2248 = vmatmul.mubr.msk.bf16.gmra.mxu0 %vm407_vm1, %v2421_v13 }
  0x41   : > { %2251 = vmatprep.mubr.msk.bf16.mxu0 %vm407_vm1, %v2422_v14 }
  0x48   : > { %2252 = vmatmul.mubr.msk.bf16.gmra.mxu0 %vm407_vm1, %v2423_v15 }
  0x49   : > { %2255 = vmatprep.mubr.msk.bf16.mxu0 %vm407_vm1, %v2424_v16 }
  0x50   : > { %2256 = vmatmul.mubr.msk.bf16.gmra.mxu0 %vm407_vm1, %v2425_v17 }
  0xd8   : > { %v2229_v18 = vpop.f32.mrf.mxu0 }
  0xd9   : > { %v503_v21 = vadd.f32 %v2229_v18, %v2746_v19 }
  0xda   : > { %v494_v20 = vpop.f32.mrf.mxu0 }
  0xdb   : > { %v495_v22 = vadd.f32 %v2746_v19, %v494_v20 }
  0xdc   : > { %v2230_v23 = vpop.f32.mrf.mxu0 }
  0xdd   : > { %v2337_v24 = vpack.i.bf16 %v503_v21, %v495_v22  ;;  %v506_v26 = vadd.f32 %v2230_v23, %v2746_v19 }
  0xde   : > { %v497_v25 = vpop.f32.mrf.mxu0 }
  0xdf   : > { %v498_v27 = vadd.f32 %v2746_v19, %v497_v25  ;;  %2338 = vxpose.xlu0.b32.start [1/2] (short) (narrow) %v2337_v24, 8 }
  0xe0   : > { %v2233_v28 = vpop.f32.mrf.mxu0 }
  0xe1   : > { %v2339_v29 = vpack.i.bf16 %v506_v26, %v498_v27  ;;  %v519_v31 = vadd.f32 %v2233_v28, %v2746_v19 }
  0xe2   : > { %v510_v30 = vpop.f32.mrf.mxu0 }
  0xe3   : > { %v511_v32 = vadd.f32 %v2746_v19, %v510_v30  ;;  %2340 = vxpose.xlu0.b32.end [2/2] (short) (narrow) %v2339_v29, 8 }
  0xe4   : > { %v2234_v33 = vpop.f32.mrf.mxu0 }
  0xe5   : > { %v2346_v35 = vpack.i.bf16 %v519_v31, %v511_v32  ;;  %v522_v37 = vadd.f32 %v2234_v33, %v2746_v19 }
  0xe6   : > { %v513_v36 = vpop.f32.mrf.mxu0 }
  0xe7   : > { %v514_v38 = vadd.f32 %v2746_v19, %v513_v36  ;;  %2347 = vxpose.xlu1.b32.start [1/2] (short) (narrow) %v2346_v35, 8 }
  0xe8   : > { %v2237_v39 = vpop.f32.mrf.mxu0 }
  0xe9   : > { %v2348_v40 = vpack.i.bf16 %v522_v37, %v514_v38  ;;  %v535_v42 = vadd.f32 %v2237_v39, %v2746_v19 }
  0xea   : > { %v526_v41 = vpop.f32.mrf.mxu0 }
  0xeb   : > { %v527_v43 = vadd.f32 %v2746_v19, %v526_v41  ;;  %2349 = vxpose.xlu1.b32.end [2/2] (short) (narrow) %v2348_v40, 8 }
  0xec   : > { %v2238_v44 = vpop.f32.mrf.mxu0 }
  0xed   : > { %v2355_v45 = vpack.i.bf16 %v535_v42, %v527_v43  ;;  %v538_v47 = vadd.f32 %v2238_v44, %v2746_v19 }
  0xee   : > { %v529_v46 = vpop.f32.mrf.mxu0 }
  0xef   : > { %v530_v48 = vadd.f32 %v2746_v19, %v529_v46  ;;  %2356 = vxpose.xlu0.b32.start [1/2] (short) (narrow) %v2355_v45, 8 }
  0xf0   : > { %v2241_v49 = vpop.f32.mrf.mxu0 }
  0xf1   : > { %v2357_v50 = vpack.i.bf16 %v538_v47, %v530_v48  ;;  %v551_v52 = vadd.f32 %v2241_v49, %v2746_v19 }
  0xf2   : > { %v542_v51 = vpop.f32.mrf.mxu0 }
  0xf3   : > { %v543_v53 = vadd.f32 %v2746_v19, %v542_v51  ;;  %2358 = vxpose.xlu0.b32.end [2/2] (short) (narrow) %v2357_v50, 8 }
  0xf4   : > { %v2242_v54 = vpop.f32.mrf.mxu0 }
  0xf5   : > { %v2364_v55 = vpack.i.bf16 %v551_v52, %v543_v53  ;;  %v554_v57 = vadd.f32 %v2242_v54, %v2746_v19 }
  0xf6   : > { %v545_v56 = vpop.f32.mrf.mxu0 }
  0xf7   : > { %v546_v58 = vadd.f32 %v2746_v19, %v545_v56  ;;  %2365 = vxpose.xlu1.b32.start [1/2] (short) (narrow) %v2364_v55, 8 }
  0xf8   : > { %v2245_v59 = vpop.f32.mrf.mxu0 }
  0xf9   : > { %v2366_v60 = vpack.i.bf16 %v554_v57, %v546_v58  ;;  %v567_v62 = vadd.f32 %v2245_v59, %v2746_v19 }
  0xfa   : > { %v558_v61 = vpop.f32.mrf.mxu0 }
  0xfb   : > { %v559_v63 = vadd.f32 %v2746_v19, %v558_v61  ;;  %2367 = vxpose.xlu1.b32.end [2/2] (short) (narrow) %v2366_v60, 8 }
  0xfc   : > { %v2246_v0 = vpop.f32.mrf.mxu0 }
  0xfd   : > { %v2373_v1 = vpack.i.bf16 %v567_v62, %v559_v63  ;;  %v570_v3 = vadd.f32 %v2246_v0, %v2746_v19 }
  0xfe   : > { %v561_v2 = vpop.f32.mrf.mxu0 }
  0xff   : > { %v562_v4 = vadd.f32 %v2746_v19, %v561_v2  ;;  %2374 = vxpose.xlu0.b32.start [1/2] (short) (narrow) %v2373_v1, 8 }
 0x100   : > { %v2249_v5 = vpop.f32.mrf.mxu0 }
 0x101   : > { %v2375_v6 = vpack.i.bf16 %v570_v3, %v562_v4  ;;  %v583_v8 = vadd.f32 %v2249_v5, %v2746_v19 }
 0x102   : > { %v574_v7 = vpop.f32.mrf.mxu0 }
 0x103   : > { %v575_v9 = vadd.f32 %v2746_v19, %v574_v7  ;;  %2376 = vxpose.xlu0.b32.end [2/2] (short) (narrow) %v2375_v6, 8 }
 0x104   : > { %v2250_v10 = vpop.f32.mrf.mxu0 }
 0x105   : > { %v2382_v11 = vpack.i.bf16 %v583_v8, %v575_v9  ;;  %v586_v13 = vadd.f32 %v2250_v10, %v2746_v19  ;;  %v2069_v9 = vld [vmem:[%s3275_s4] ss:$0 sm:$0xff] }
 0x106   : > { %v577_v12 = vpop.f32.mrf.mxu0 }
 0x107   : > { %v578_v14 = vadd.f32 %v2746_v19, %v577_v12  ;;  %2383 = vxpose.xlu1.b32.start [1/2] (short) (narrow) %v2382_v11, 8 }
 0x108   : > { %v2253_v15 = vpop.f32.mrf.mxu0 }
 0x109   : > { %v2384_v16 = vpack.i.bf16 %v586_v13, %v578_v14  ;;  %v599_v18 = vadd.f32 %v2253_v15, %v2746_v19 }
 0x10a   : > { %v590_v17 = vpop.f32.mrf.mxu0 }
 0x10b   : > { %v591_v20 = vadd.f32 %v2746_v19, %v590_v17  ;;  %2385 = vxpose.xlu1.b32.end [2/2] (short) (narrow) %v2384_v16, 8 }
 0x10c   : > { %v2254_v21 = vpop.f32.mrf.mxu0 }
 0x10d   : > { %v2391_v22 = vpack.i.bf16 %v599_v18, %v591_v20  ;;  %v602_v24 = vadd.f32 %v2254_v21, %v2746_v19 }
 0x10e   : > { %v593_v23 = vpop.f32.mrf.mxu0 }
 0x10f   : > { %v594_v25 = vadd.f32 %v2746_v19, %v593_v23  ;;  %2392 = vxpose.xlu0.b32.start [1/2] (short) (narrow) %v2391_v22, 8 }
 0x110   : > { %v2257_v26 = vpop.f32.mrf.mxu0 }
 0x111   : > { %v2393_v27 = vpack.i.bf16 %v602_v24, %v594_v25  ;;  %v615_v29 = vadd.f32 %v2257_v26, %v2746_v19 }
 0x112   : > { %v606_v28 = vpop.f32.mrf.mxu0 }
 0x113   : > { %v607_v30 = vadd.f32 %v2746_v19, %v606_v28  ;;  %2394 = vxpose.xlu0.b32.end [2/2] (short) (narrow) %v2393_v27, 8 }
 0x114   : > { %v2258_v31 = vpop.f32.mrf.mxu0 }
 0x115   : > { %v2400_v32 = vpack.i.bf16 %v615_v29, %v607_v30  ;;  %v618_v34 = vadd.f32 %v2258_v31, %v2746_v19 }
 0x116   : > { %v609_v33 = vpop.f32.mrf.mxu0 }
 0x117   : > { %v610_v35 = vadd.f32 %v2746_v19, %v609_v33  ;;  %2401 = vxpose.xlu1.b32.start [1/2] (short) (narrow) %v2400_v32, 8 }
 0x119   : > { %v2402_v36 = vpack.i.bf16 %v618_v34, %v610_v35 }
 0x11b   : > { %2403 = vxpose.xlu1.b32.end [2/2] (short) (narrow) %v2402_v36, 8 }
 0x15b   : > { %v2341_v37 = vpop.trf.xlu0 }
 0x15c   : > { %v2345_v38 = vunpack.i.h.bf16 %v2341_v37  ;;  %v2342_v39 = vunpack.i.l.bf16 %v2341_v37 }
 0x15e   : > { %v1133_v40 = vpack.c.bf16 %v2345_v38, %v2342_v39  ;;  %v2427_v38 = vld [vmem:[%s3276_s5 + $0x70] ss:$8 sps:$4 sm:$0xff]   ;;  %v2429_v39 = vld [vmem:[%s3276_s5 + $0x74] ss:$8 sps:$4 sm:$0xff]  }
 0x15f   : > { %1631 = vmatprep.subr.bf16.mxu0 %v2429_v39  ;;  %2277 = vmatprep.subr.bf16.mxu1 %v2429_v39 }
 0x160   : > { %2261 = vmatprep.mubr.msk.bf16.mxu1 %vm1154_vm2, %v1133_v40  ;;  %1632 = vmatpush1.bf16.msra.mxu0 %v2427_v38  ;;  %v1340_v40 = vlaneseq }
 0x163   : > { %v2350_v41 = vpop.trf.xlu1 }
 0x164   : > { %v2354_v42 = vunpack.i.h.bf16 %v2350_v41  ;;  %v2351_v43 = vunpack.i.l.bf16 %v2350_v41  ;;  %v1341_v41 = vand.u32 127, %v1340_v40 }
 0x166   : > { %v1134_v44 = vpack.c.bf16 %v2354_v42, %v2351_v43  ;;  %vm1342_vm3 = vcmp.lt.s32.totalorder %v1341_v41, 32 }
 0x168   : > { %2262 = vmatmul.mubr.msk.bf16.vlgmr.msra.gmra.mxu1 %vm1154_vm2, %v1134_v44  ;;  %v2609_v44 = vmov 0.0  }
 0x169   : > { %2285 = vmatpush1.bf16.msra.mxu1 %v2427_v38 }
 0x16b   : > { %v2359_v45 = vpop.trf.xlu0 }
 0x16c   : > { %v2363_v46 = vunpack.i.h.bf16 %v2359_v45  ;;  %v2360_v47 = vunpack.i.l.bf16 %v2359_v45  ;;  %v2843_v45 = vsel %vm1342_vm3, 1.0, %v2609_v44  ;;  %v2439_v44 = vld [vmem:[%s3276_s5 + $0x30] ss:$8 sps:$4 sm:$0xff]  }
 0x16e   : > { %v1135_v19 = vpack.c.bf16 %v2363_v46, %v2360_v47 }
 0x170   : > { %2265 = vmatprep.mubr.msk.bf16.mxu1 %vm1154_vm2, %v1135_v19 }
 0x173   : > { %v2368_v48 = vpop.trf.xlu1 }
 0x174   : > { %v2372_v49 = vunpack.i.h.bf16 %v2368_v48  ;;  %v2369_v50 = vunpack.i.l.bf16 %v2368_v48 }
 0x176   : > { %v1136_v51 = vpack.c.bf16 %v2372_v49, %v2369_v50 }
 0x178   : > { %2266 = vmatmul.mubr.msk.bf16.gmra.mxu1 %vm1154_vm2, %v1136_v51 }
 0x17b   : > { %v2377_v52 = vpop.trf.xlu0 }
 0x17c   : > { %v2381_v53 = vunpack.i.h.bf16 %v2377_v52  ;;  %v2378_v54 = vunpack.i.l.bf16 %v2377_v52 }
 0x17e   : > { %v1137_v55 = vpack.c.bf16 %v2381_v53, %v2378_v54 }
 0x180   : > { %2269 = vmatprep.mubr.msk.bf16.mxu1 %vm1154_vm2, %v1137_v55 }
 0x183   : > { %v2386_v56 = vpop.trf.xlu1 }
 0x184   : > { %v2390_v57 = vunpack.i.h.bf16 %v2386_v56  ;;  %v2387_v58 = vunpack.i.l.bf16 %v2386_v56 }
 0x186   : > { %v1138_v59 = vpack.c.bf16 %v2390_v57, %v2387_v58 }
 0x188   : > { %2270 = vmatmul.mubr.msk.bf16.gmra.mxu1 %vm1154_vm2, %v1138_v59 }
 0x18b   : > { %v2395_v60 = vpop.trf.xlu0 }
 0x18c   : > { %v2399_v61 = vunpack.i.h.bf16 %v2395_v60  ;;  %v2396_v62 = vunpack.i.l.bf16 %v2395_v60 }
 0x18e   : > { %v1139_v63 = vpack.c.bf16 %v2399_v61, %v2396_v62 }
 0x190   : > { %2273 = vmatprep.mubr.msk.bf16.mxu1 %vm1154_vm2, %v1139_v63 }
 0x193   : > { %v2404_v0 = vpop.trf.xlu1 }
 0x194   : > { %v2408_v1 = vunpack.i.h.bf16 %v2404_v0  ;;  %v2405_v2 = vunpack.i.l.bf16 %v2404_v0 }
 0x196   : > { %v1140_v3 = vpack.c.bf16 %v2408_v1, %v2405_v2  ;;  %v2432_v2 = vld [vmem:[%s3276_s5 + $0x64] ss:$8 sps:$4 sm:$0xff]  }
 0x197   : > { %2278 = vmatprep.subr.bf16.mxu1 %v2432_v2  ;;  %1633 = vmatprep.subr.bf16.mxu0 %v2432_v2 }
 0x198   : > { %2274 = vmatmul.mubr.msk.bf16.gmra.mxu1 %vm1154_vm2, %v1140_v3 }
 0x228   : > { %v2263_v4 = vpop.f32.mrf.mxu1 }
 0x229   : > { %v2821_v33 = vadd.f32 %v2263_v4, %v2069_v9 }
 0x22a   : > { %v1213_v5 = vpop.f32.mrf.mxu1 }
 0x22b   : > { %v2809_v25 = vadd.f32 %v2069_v9, %v1213_v5  ;;  %v2430_v5 = vld [vmem:[%s3276_s5 + $0x60] ss:$8 sps:$4 sm:$0xff]  }
 0x22c   : > { %v2264_v6 = vpop.f32.mrf.mxu1  ;;  %2286 = vmatpush1.bf16.msra.mxu1 %v2430_v5  ;;  %1634 = vmatpush1.bf16.msra.mxu0 %v2430_v5 }
 0x22d   : > { %v2827_v35 = vadd.f32 %v2264_v6, %v2069_v9 }
 0x22e   : > { %v1216_v7 = vpop.f32.mrf.mxu1 }
 0x22f   : > { %v2815_v27 = vadd.f32 %v2069_v9, %v1216_v7 }
 0x238   : > { %v2267_v8 = vpop.f32.mrf.mxu1 }
 0x239   : > { %v2794_v15 = vadd.f32 %v2267_v8, %v2069_v9 }
 0x23a   : > { %v1229_v10 = vpop.f32.mrf.mxu1 }
 0x23b   : > { %v1230_v11 = vadd.f32 %v2069_v9, %v1229_v10 }
 0x23c   : > { %v2268_v12 = vpop.f32.mrf.mxu1 }
 0x23d   : > { %1284 = vadd.xlane.f32.xlu0 %v1230_v11  ;;  %v2797_v16 = vadd.f32 %v2268_v12, %v2069_v9  ;;  %v2435_v12 = vld [vmem:[%s3276_s5 + $0x54] ss:$8 sps:$4 sm:$0xff]  }
 0x23e   : > { %v1232_v13 = vpop.f32.mrf.mxu1  ;;  %2279 = vmatprep.subr.bf16.mxu1 %v2435_v12  ;;  %1635 = vmatprep.subr.bf16.mxu0 %v2435_v12 }
 0x23f   : > { %v1233_v14 = vadd.f32 %v2069_v9, %v1232_v13 }
 0x241   : > { %1286 = vadd.xlane.f32.xlu1 %v1233_v14 }
 0x245   : > { %1288 = vadd.xlane.f32.xlu1 %v2794_v15 }
 0x248   : > { %v2271_v17 = vpop.f32.mrf.mxu1 }
 0x249   : > { %1290 = vadd.xlane.f32.xlu1 %v2797_v16  ;;  %v2803_v23 = vadd.f32 %v2271_v17, %v2069_v9 }
 0x24a   : > { %v1245_v18 = vpop.f32.mrf.mxu1 }
 0x24b   : > { %v2800_v20 = vadd.f32 %v2069_v9, %v1245_v18 }
 0x24c   : > { %v2272_v21 = vpop.f32.mrf.mxu1 }
 0x24d   : > { %1292 = vadd.xlane.f32.xlu0 %v2800_v20  ;;  %v2811_v26 = vadd.f32 %v2272_v21, %v2069_v9 }
 0x24e   : > { %v1248_v22 = vpop.f32.mrf.mxu1 }
 0x24f   : > { %v2805_v24 = vadd.f32 %v2069_v9, %v1248_v22 }
 0x251   : > { %1294 = vadd.xlane.f32.xlu1 %v2805_v24  ;;  %1296 = vadd.xlane.f32.xlu0 %v2803_v23 }
 0x255   : > { %1298 = vadd.xlane.f32.xlu1 %v2811_v26  ;;  %1276 = vadd.xlane.f32.xlu0 %v2809_v25 }
 0x258   : > { %v2275_v28 = vpop.f32.mrf.mxu1 }
 0x259   : > { %1278 = vadd.xlane.f32.xlu1 %v2815_v27  ;;  %v2829_v36 = vadd.f32 %v2275_v28, %v2069_v9  ;;  %v2438_v28 = vld [vmem:[%s3276_s5 + $0x44] ss:$8 sps:$4 sm:$0xff]  }
 0x25a   : > { %v1261_v29 = vpop.f32.mrf.mxu1 }
 0x25b   : > { %v2818_v30 = vadd.f32 %v2069_v9, %v1261_v29 }
 0x25c   : > { %v2276_v31 = vpop.f32.mrf.mxu1 }
 0x25d   : > { %1300 = vadd.xlane.f32.xlu0 %v2818_v30  ;;  %v2833_v37 = vadd.f32 %v2276_v31, %v2069_v9  ;;  %v2436_v31 = vld [vmem:[%s3276_s5 + $0x40] ss:$8 sps:$4 sm:$0xff]  }
 0x25e   : > { %v1264_v32 = vpop.f32.mrf.mxu1 }
 0x25f   : > { %v2823_v34 = vadd.f32 %v2069_v9, %v1264_v32 }
 0x261   : > { %1302 = vadd.xlane.f32.xlu1 %v2823_v34  ;;  %1280 = vadd.xlane.f32.xlu0 %v2821_v33 }
 0x265   : > { %1282 = vadd.xlane.f32.xlu1 %v2827_v35  ;;  %1304 = vadd.xlane.f32.xlu0 %v2829_v36 }
 0x269   : > { %1306 = vadd.xlane.f32.xlu1 %v2833_v37 }
 0x2c6   : > { %v1285_v42 = vpop.xlane.xlu0 %1284 }
 0x2c7   : > { %v1312_v43 = vmul.f32 0.03125, %v1285_v42  ;;  %v2441_v42 = vld [vmem:[%s3276_s5 + $0x34] ss:$8 sps:$4 sm:$0xff]  }
 0x2c9   : > { %v1328_v46 = vsub.f32 %v1230_v11, %v1312_v43 }
 0x2ca   : > { %v1287_v47 = vpop.xlane.xlu1 %1286 }
 0x2cb   : > { %v1313_v19 = vmul.f32 0.03125, %v1287_v47  ;;  %v2846_v48 = vmul.f32 %v2843_v45, %v1328_v46 }
 0x2cd   : > { %v1329_v49 = vsub.f32 %v1233_v14, %v1313_v19  ;;  %v1365_v50 = vmul.f32 %v2846_v48, %v2846_v48 }
 0x2ce   : > { %v1289_v51 = vpop.xlane.xlu1 %1288 }
 0x2cf   : > { %v1314_v52 = vmul.f32 0.03125, %v1289_v51  ;;  %1385 = vadd.xlane.f32.xlu0 %v1365_v50  ;;  %v2851_v53 = vmul.f32 %v2843_v45, %v1329_v49  ;;  %v2444_v49 = vld [vmem:[%s3276_s5 + $0x24] ss:$8 sps:$4 sm:$0xff]  }
 0x2d1   : > { %v1330_v54 = vsub.f32 %v2794_v15, %v1314_v52  ;;  %v1366_v55 = vmul.f32 %v2851_v53, %v2851_v53  ;;  %v2433_v15 = vld [vmem:[%s3276_s5 + $0x50] ss:$8 sps:$4 sm:$0xff]   ;;  %v2442_v52 = vld [vmem:[%s3276_s5 + $0x20] ss:$8 sps:$4 sm:$0xff]  }
 0x2d2   : > { %v1291_v56 = vpop.xlane.xlu1 %1290  ;;  %2287 = vmatpush1.bf16.msra.mxu1 %v2433_v15  ;;  %1636 = vmatpush1.bf16.msra.mxu0 %v2433_v15 }
 0x2d3   : > { %v1315_v57 = vmul.f32 0.03125, %v1291_v56  ;;  %1387 = vadd.xlane.f32.xlu1 %v1366_v55  ;;  %v2857_v58 = vmul.f32 %v2843_v45, %v1330_v54  ;;  %2280 = vmatprep.subr.bf16.mxu1 %v2438_v28 }
 0x2d4   : > { %1637 = vmatprep.subr.bf16.mxu0 %v2438_v28 }
 0x2d5   : > { %v1331_v59 = vsub.f32 %v2797_v16, %v1315_v57  ;;  %v1367_v60 = vmul.f32 %v2857_v58, %v2857_v58 }
 0x2d6   : > { %v1293_v61 = vpop.xlane.xlu0 %1292  ;;  %2288 = vmatpush1.bf16.msra.mxu1 %v2436_v31  ;;  %1638 = vmatpush1.bf16.msra.mxu0 %v2436_v31 }
 0x2d7   : > { %v1316_v62 = vmul.f32 0.03125, %v1293_v61  ;;  %1389 = vadd.xlane.f32.xlu0 %v1367_v60  ;;  %v2863_v63 = vmul.f32 %v2843_v45, %v1331_v59  ;;  %2281 = vmatprep.subr.bf16.mxu1 %v2441_v42 }
 0x2d8   : > { %1639 = vmatprep.subr.bf16.mxu0 %v2441_v42 }
 0x2d9   : > { %v1332_v0 = vsub.f32 %v2800_v20, %v1316_v62  ;;  %v1368_v1 = vmul.f32 %v2863_v63, %v2863_v63  ;;  %v2447_v62 = vld [vmem:[%s3276_s5 + $0x14] ss:$8 sps:$4 sm:$0xff]  }
 0x2da   : > { %v1295_v3 = vpop.xlane.xlu1 %1294  ;;  %v1297_v4 = vpop.xlane.xlu0 %1296  ;;  %2289 = vmatpush1.bf16.msra.mxu1 %v2439_v44  ;;  %1640 = vmatpush1.bf16.msra.mxu0 %v2439_v44 }
 0x2db   : > { %v1317_v6 = vmul.f32 0.03125, %v1295_v3  ;;  %v1318_v7 = vmul.f32 0.03125, %v1297_v4  ;;  %1391 = vadd.xlane.f32.xlu1 %v1368_v1  ;;  %v2875_v8 = vmul.f32 %v2843_v45, %v1332_v0  ;;  %2282 = vmatprep.subr.bf16.mxu1 %v2444_v49 }
 0x2dc   : > { %1641 = vmatprep.subr.bf16.mxu0 %v2444_v49 }
 0x2dd   : > { %v1333_v9 = vsub.f32 %v2805_v24, %v1317_v6  ;;  %v1334_v10 = vsub.f32 %v2803_v23, %v1318_v7  ;;  %v1369_v11 = vmul.f32 %v2875_v8, %v2875_v8 }
 0x2de   : > { %v1299_v13 = vpop.xlane.xlu1 %1298  ;;  %v1277_v14 = vpop.xlane.xlu0 %1276  ;;  %2290 = vmatpush1.bf16.msra.mxu1 %v2442_v52  ;;  %1642 = vmatpush1.bf16.msra.mxu0 %v2442_v52 }
 0x2df   : > { %v1319_v16 = vmul.f32 0.03125, %v1299_v13  ;;  %v1308_v17 = vmul.f32 0.03125, %v1277_v14  ;;  %1393 = vadd.xlane.f32.xlu0 %v1369_v11  ;;  %v2888_v18 = vmul.f32 %v2843_v45, %v1333_v9  ;;  %v2891_v20 = vmul.f32 %v2843_v45, %v1334_v10  ;;  %2283 = vmatprep.subr.bf16.mxu1 %v2447_v62  ;;  %v2450_v9 = vld [vmem:[%s3276_s5 + $0x4] ss:$8 sps:$4 sm:$0xff]   ;;  %v2448_v11 = vld [vmem:[%s3276_s5] ss:$8 sps:$4 sm:$0xff]  }
 0x2e0   : > { %1643 = vmatprep.subr.bf16.mxu0 %v2447_v62 }
 0x2e1   : > { %v1335_v21 = vsub.f32 %v2811_v26, %v1319_v16  ;;  %v1324_v22 = vsub.f32 %v2809_v25, %v1308_v17  ;;  %v1370_v23 = vmul.f32 %v2888_v18, %v2888_v18  ;;  %v1371_v24 = vmul.f32 %v2891_v20, %v2891_v20 }
 0x2e2   : > { %v1279_v29 = vpop.xlane.xlu1 %1278  ;;  %v2610_v16 = vmov 0  }
 0x2e3   : > { %v1309_v32 = vmul.f32 0.03125, %v1279_v29  ;;  %1395 = vadd.xlane.f32.xlu1 %v1370_v23  ;;  %1397 = vadd.xlane.f32.xlu0 %v1371_v24  ;;  %v2906_v25 = vmul.f32 %v2843_v45, %v1335_v21  ;;  %v2909_v26 = vmul.f32 %v2843_v45, %v1324_v22 }
 0x2e4   : > { %1683 = vmatprep.mubr.bf16.mxu1 %v2610_v16  ;;  %1663 = vmatprep.mubr.bf16.mxu0 %v2610_v16 }
 0x2e5   : > { %v1325_v38 = vsub.f32 %v2815_v27, %v1309_v32  ;;  %v1372_v39 = vmul.f32 %v2906_v25, %v2906_v25  ;;  %v1361_v41 = vmul.f32 %v2909_v26, %v2909_v26 }
 0x2e6   : > { %v1301_v43 = vpop.xlane.xlu0 %1300 }
 0x2e7   : > { %v1320_v46 = vmul.f32 0.03125, %v1301_v43  ;;  %1399 = vadd.xlane.f32.xlu1 %v1372_v39  ;;  %1377 = vadd.xlane.f32.xlu0 %v1361_v41  ;;  %v2923_v27 = vmul.f32 %v2843_v45, %v1325_v38 }
 0x2e9   : > { %v1336_v47 = vsub.f32 %v2818_v30, %v1320_v46  ;;  %v1362_v19 = vmul.f32 %v2923_v27, %v2923_v27 }
 0x2ea   : > { %v1303_v50 = vpop.xlane.xlu1 %1302  ;;  %v1281_v51 = vpop.xlane.xlu0 %1280 }
 0x2eb   : > { %v1321_v54 = vmul.f32 0.03125, %v1303_v50  ;;  %v1310_v55 = vmul.f32 0.03125, %v1281_v51  ;;  %1379 = vadd.xlane.f32.xlu1 %v1362_v19  ;;  %v2935_v30 = vmul.f32 %v2843_v45, %v1336_v47  ;;  %v2987_v47 = vld [vmem:[%s3275_s4 + $0x1] ss:$0 sm:$0xff] }
 0x2ed   : > { %v1337_v56 = vsub.f32 %v2823_v34, %v1321_v54  ;;  %v1326_v57 = vsub.f32 %v2821_v33, %v1310_v55  ;;  %v1373_v59 = vmul.f32 %v2935_v30, %v2935_v30  ;;  %v2445_v33 = vld [vmem:[%s3276_s5 + $0x10] ss:$8 sps:$4 sm:$0xff]  }
 0x2ee   : > { %v1283_v60 = vpop.xlane.xlu1 %1282  ;;  %v1305_v61 = vpop.xlane.xlu0 %1304  ;;  %2291 = vmatpush1.bf16.msra.mxu1 %v2445_v33  ;;  %1644 = vmatpush1.bf16.msra.mxu0 %v2445_v33 }
 0x2ef   : > { %v1311_v0 = vmul.f32 0.03125, %v1283_v60  ;;  %v1322_v1 = vmul.f32 0.03125, %v1305_v61  ;;  %1401 = vadd.xlane.f32.xlu0 %v1373_v59  ;;  %v2945_v2 = vmul.f32 %v2843_v45, %v1337_v56  ;;  %v2948_v34 = vmul.f32 %v2843_v45, %v1326_v57  ;;  %2284 = vmatprep.subr.bf16.mxu1 %v2450_v9 }
 0x2f0   : > { %1645 = vmatprep.subr.bf16.mxu0 %v2450_v9 }
 0x2f1   : > { %v1327_v3 = vsub.f32 %v2827_v35, %v1311_v0  ;;  %v1338_v4 = vsub.f32 %v2829_v36, %v1322_v1  ;;  %v1374_v5 = vmul.f32 %v2945_v2, %v2945_v2  ;;  %v1363_v6 = vmul.f32 %v2948_v34, %v2948_v34 }
 0x2f2   : > { %v1307_v7 = vpop.xlane.xlu1 %1306  ;;  %2292 = vmatpush1.bf16.msra.mxu1 %v2448_v11  ;;  %1646 = vmatpush1.bf16.msra.mxu0 %v2448_v11 }
 0x2f3   : > { %v1323_v10 = vmul.f32 0.03125, %v1307_v7  ;;  %1403 = vadd.xlane.f32.xlu1 %v1374_v5  ;;  %1381 = vadd.xlane.f32.xlu0 %v1363_v6  ;;  %v2963_v35 = vmul.f32 %v2843_v45, %v1327_v3  ;;  %v2966_v36 = vmul.f32 %v2843_v45, %v1338_v4 }
 0x2f5   : > { %v1339_v12 = vsub.f32 %v2833_v37, %v1323_v10  ;;  %v1364_v13 = vmul.f32 %v2963_v35, %v2963_v35  ;;  %v1375_v14 = vmul.f32 %v2966_v36, %v2966_v36 }
 0x2f7   : > { %1383 = vadd.xlane.f32.xlu1 %v1364_v13  ;;  %1405 = vadd.xlane.f32.xlu0 %v1375_v14  ;;  %v2977_v15 = vmul.f32 %v2843_v45, %v1339_v12 }
 0x2f9   : > { %v1376_v37 = vmul.f32 %v2977_v15, %v2977_v15 }
 0x2fb   : > { %1407 = vadd.xlane.f32.xlu1 %v1376_v37 }
 0x358   : > { %v1386_v17 = vpop.xlane.xlu0 %1385 }
 0x359   : > { %v1413_v21 = vmul.f32 0.03125, %v1386_v17 }
 0x35b   : > { %v1429_v22 = vadd.f32 1e-05, %v1413_v21 }
 0x35c   : > { %v1388_v23 = vpop.xlane.xlu1 %1387 }
 0x35d   : > { %2451 = vrsqrt.f32 %v1429_v22  ;;  %v1414_v24 = vmul.f32 0.03125, %v1388_v23 }
 0x35f   : > { %v1430_v28 = vadd.f32 1e-05, %v1414_v24 }
 0x360   : > { %v1390_v29 = vpop.xlane.xlu0 %1389 }
 0x361   : > { %2453 = vrsqrt.f32 %v1430_v28  ;;  %v1415_v45 = vmul.f32 0.03125, %v1390_v29 }
 0x363   : > { %v1431_v31 = vadd.f32 1e-05, %v1415_v45 }
 0x364   : > { %v1392_v32 = vpop.xlane.xlu1 %1391 }
 0x365   : > { %2455 = vrsqrt.f32 %v1431_v31  ;;  %v1416_v38 = vmul.f32 0.03125, %v1392_v32 }
 0x367   : > { %v1432_v39 = vadd.f32 1e-05, %v1416_v38 }
 0x368   : > { %v1394_v41 = vpop.xlane.xlu0 %1393 }
 0x369   : > { %2457 = vrsqrt.f32 %v1432_v39  ;;  %v1417_v42 = vmul.f32 0.03125, %v1394_v41 }
 0x36a   : > { %v2452_v43 = vpop.eup %2451 }
 0x36b   : > { %v1461_v44 = vmul.f32 %v2452_v43, %v2846_v48  ;;  %v1433_v46 = vadd.f32 1e-05, %v1417_v42  ;;  %v2994_v48 = vld [vmem:[%s3275_s4 + $0x2] ss:$0 sm:$0xff] }
 0x36c   : > { %v1396_v19 = vpop.xlane.xlu1 %1395  ;;  %v1398_v49 = vpop.xlane.xlu0 %1397 }
 0x36d   : > { %2459 = vrsqrt.f32 %v1433_v46  ;;  %v1418_v50 = vmul.f32 0.03125, %v1396_v19  ;;  %v1419_v51 = vmul.f32 0.03125, %v1398_v49  ;;  %v1482_v54 = vmul.f32 %v2987_v47, %v1461_v44 }
 0x36e   : > { %v2454_v52 = vpop.eup %2453 }
 0x36f   : > { %v1462_v55 = vmul.f32 %v2454_v52, %v2851_v53  ;;  %v1434_v56 = vadd.f32 1e-05, %v1418_v50  ;;  %v1435_v57 = vadd.f32 1e-05, %v1419_v51  ;;  %v1503_v33 = vadd.f32 %v2994_v48, %v1482_v54 }
 0x370   : > { %v1400_v59 = vpop.xlane.xlu1 %1399  ;;  %v1378_v60 = vpop.xlane.xlu0 %1377 }
 0x371   : > { %2461 = vrsqrt.f32 %v1434_v56  ;;  %v1420_v61 = vmul.f32 0.03125, %v1400_v59  ;;  %v1409_v62 = vmul.f32 0.03125, %v1378_v60  ;;  %v1483_v0 = vmul.f32 %v2987_v47, %v1462_v55 }
 0x372   : > { %v2456_v1 = vpop.eup %2455  ;;  %2463 = vrsqrt.f32 %v1435_v57 }
 0x373   : > { %v1436_v3 = vadd.f32 1e-05, %v1420_v61  ;;  %v1425_v53 = vadd.f32 1e-05, %v1409_v62  ;;  %v1504_v4 = vadd.f32 %v2994_v48, %v1483_v0  ;;  %v1463_v5 = vmul.f32 %v2456_v1, %v2857_v58 }
 0x374   : > { %v1380_v6 = vpop.xlane.xlu1 %1379 }
 0x375   : > { %2465 = vrsqrt.f32 %v1436_v3  ;;  %v1410_v7 = vmul.f32 0.03125, %v1380_v6  ;;  %v1517_v9 = vpack.c.bf16 %v1504_v4, %v1503_v33  ;;  %v1484_v13 = vmul.f32 %v2987_v47, %v1463_v5 }
 0x376   : > { %v2458_v10 = vpop.eup %2457  ;;  %2467 = vrsqrt.f32 %v1425_v53 }
 0x377   : > { %v1426_v11 = vadd.f32 1e-05, %v1410_v7  ;;  %1684 = vmatmul.mubr.bf16.vlgmr.msra.gmra.mxu1 %v1517_v9  ;;  %v1464_v12 = vmul.f32 %v2458_v10, %v2863_v63  ;;  %v1505_v22 = vadd.f32 %v2994_v48, %v1484_v13 }
 0x378   : > { %v1402_v14 = vpop.xlane.xlu0 %1401  ;;  %1693 = vmatprep.mubr.bf16.mxu1 %v2610_v16 }
 0x379   : > { %2469 = vrsqrt.f32 %v1426_v11  ;;  %v1421_v37 = vmul.f32 0.03125, %v1402_v14  ;;  %v1485_v17 = vmul.f32 %v2987_v47, %v1464_v12 }
 0x37a   : > { %v2460_v58 = vpop.eup %2459 }
 0x37b   : > { %v1437_v21 = vadd.f32 1e-05, %v1421_v37  ;;  %v1506_v23 = vadd.f32 %v2994_v48, %v1485_v17  ;;  %v1465_v24 = vmul.f32 %v2460_v58, %v2875_v8 }
 0x37c   : > { %v1404_v28 = vpop.xlane.xlu1 %1403  ;;  %v1382_v29 = vpop.xlane.xlu0 %1381 }
 0x37d   : > { %2471 = vrsqrt.f32 %v1437_v21  ;;  %v1422_v63 = vmul.f32 0.03125, %v1404_v28  ;;  %v1411_v45 = vmul.f32 0.03125, %v1382_v29  ;;  %v1518_v31 = vpack.c.bf16 %v1506_v23, %v1505_v22 }
 0x37e   : > { %v2462_v32 = vpop.eup %2461  ;;  %v1486_v38 = vmul.f32 %v2987_v47, %v1465_v24 }
 0x37f   : > { %v2464_v39 = vpop.eup %2463  ;;  %v1438_v41 = vadd.f32 1e-05, %v1422_v63  ;;  %v1427_v42 = vadd.f32 1e-05, %v1411_v45  ;;  %1694 = vmatmul.mubr.bf16.gmra.mxu1 %v1518_v31  ;;  %v1466_v43 = vmul.f32 %v2462_v32, %v2888_v18 }
 0x380   : > { %v1384_v44 = vpop.xlane.xlu1 %1383  ;;  %v1406_v46 = vpop.xlane.xlu0 %1405  ;;  %1703 = vmatprep.mubr.bf16.mxu1 %v2610_v16  ;;  %v1507_v51 = vadd.f32 %v2994_v48, %v1486_v38  ;;  %v1467_v52 = vmul.f32 %v2464_v39, %v2891_v20 }
 0x381   : > { %2473 = vrsqrt.f32 %v1438_v41  ;;  %v1412_v8 = vmul.f32 0.03125, %v1384_v44  ;;  %v1423_v19 = vmul.f32 0.03125, %v1406_v46  ;;  %v1487_v49 = vmul.f32 %v2987_v47, %v1466_v43 }
 0x382   : > { %v2466_v50 = vpop.eup %2465  ;;  %2475 = vrsqrt.f32 %v1427_v42  ;;  %v1488_v53 = vmul.f32 %v2987_v47, %v1467_v52  ;;  %v3048_v42 = vshrl.u32 %v1340_v40, 7 }
 0x383   : > { %v2468_v54 = vpop.eup %2467  ;;  %v1428_v55 = vadd.f32 1e-05, %v1412_v8  ;;  %v1439_v56 = vadd.f32 1e-05, %v1423_v19  ;;  %v1508_v18 = vadd.f32 %v2994_v48, %v1487_v49  ;;  %v1468_v57 = vmul.f32 %v2466_v50, %v2906_v25 }
 0x384   : > { %v1457_v59 = vmul.f32 %v2468_v54, %v2909_v26  ;;  %v1408_v60 = vpop.xlane.xlu1 %1407  ;;  %v1547_v43 = vsub.s32 1, %v3048_v42 }
 0x385   : > { %2477 = vrsqrt.f32 %v1428_v55  ;;  %v1424_v61 = vmul.f32 0.03125, %v1408_v60  ;;  %v1519_v62 = vpack.c.bf16 %v1508_v18, %v1507_v51  ;;  %v1489_v0 = vmul.f32 %v2987_v47, %v1468_v57 }
 0x386   : > { %v2470_v1 = vpop.eup %2469  ;;  %2479 = vrsqrt.f32 %v1439_v56  ;;  %v1478_v3 = vmul.f32 %v2987_v47, %v1457_v59 }
 0x387   : > { %v1458_v33 = vmul.f32 %v2470_v1, %v2923_v27  ;;  %v1440_v20 = vadd.f32 1e-05, %v1424_v61  ;;  %1704 = vmatmul.mubr.bf16.gmra.mxu1 %v1519_v62  ;;  %v1510_v26 = vadd.f32 %v2994_v48, %v1489_v0  ;;  %v1509_v27 = vadd.f32 %v2994_v48, %v1488_v53 }
 0x388   : > { %1713 = vmatprep.mubr.bf16.mxu1 %v2610_v16  ;;  %v1499_v5 = vadd.f32 %v2994_v48, %v1478_v3 }
 0x389   : > { %2481 = vrsqrt.f32 %v1440_v20  ;;  %v1479_v25 = vmul.f32 %v2987_v47, %v1458_v33  ;;  %v1520_v10 = vpack.c.bf16 %v1510_v26, %v1509_v27 }
 0x38a   : > { %v2472_v4 = vpop.eup %2471 }
 0x38b   : > { %v1500_v6 = vadd.f32 %v2994_v48, %v1479_v25  ;;  %v1469_v7 = vmul.f32 %v2472_v4, %v2935_v30 }
 0x38d   : > { %v1515_v9 = vpack.c.bf16 %v1500_v6, %v1499_v5  ;;  %v1490_v14 = vmul.f32 %v2987_v47, %v1469_v7 }
 0x38e   : > { %v2474_v11 = vpop.eup %2473 }
 0x38f   : > { %v2476_v12 = vpop.eup %2475  ;;  %1664 = vmatmul.mubr.bf16.vlgmr.msra.gmra.mxu0 %v1515_v9  ;;  %1714 = vmatmul.mubr.bf16.gmra.mxu1 %v1520_v10  ;;  %v1470_v13 = vmul.f32 %v2474_v11, %v2945_v2  ;;  %v1511_v21 = vadd.f32 %v2994_v48, %v1490_v14 }
 0x390   : > { %1723 = vmatprep.mubr.bf16.mxu1 %v2610_v16  ;;  %1673 = vmatprep.mubr.bf16.mxu0 %v2610_v16  ;;  %v1459_v37 = vmul.f32 %v2476_v12, %v2948_v34 }
 0x391   : > { %v1491_v17 = vmul.f32 %v2987_v47, %v1470_v13 }
 0x392   : > { %v2478_v58 = vpop.eup %2477  ;;  %v1480_v2 = vmul.f32 %v2987_v47, %v1459_v37 }
 0x393   : > { %v2480_v30 = vpop.eup %2479  ;;  %v1512_v22 = vadd.f32 %v2994_v48, %v1491_v17  ;;  %v1460_v23 = vmul.f32 %v2478_v58, %v2963_v35 }
 0x394   : > { %v1471_v24 = vmul.f32 %v2480_v30, %v2966_v36  ;;  %v1501_v34 = vadd.f32 %v2994_v48, %v1480_v2 }
 0x395   : > { %v1521_v28 = vpack.c.bf16 %v1512_v22, %v1511_v21  ;;  %v1481_v29 = vmul.f32 %v2987_v47, %v1460_v23  ;;  %v1543_v23 = vsub.s32 0, %v3048_v42 }
 0x396   : > { %v2482_v63 = vpop.eup %2481  ;;  %v1492_v32 = vmul.f32 %v2987_v47, %v1471_v24 }
 0x397   : > { %1724 = vmatmul.mubr.bf16.gmra.mxu1 %v1521_v28  ;;  %v1502_v45 = vadd.f32 %v2994_v48, %v1481_v29  ;;  %v1472_v31 = vmul.f32 %v2482_v63, %v2977_v15  ;;  %v3054_v15 = vld [vmem:[%s3277_s6] sm:$0x3] }
 0x398   : > { %1733 = vmatprep.mubr.bf16.mxu1 %v2610_v16  ;;  %v1513_v36 = vadd.f32 %v2994_v48, %v1492_v32  ;;  %v3057_v16 = vrot.slane %v3054_v15, %v1547_v43 }
 0x399   : > { %v1516_v35 = vpack.c.bf16 %v1502_v45, %v1501_v34  ;;  %v1493_v38 = vmul.f32 %v2987_v47, %v1472_v31  ;;  %v3126_v31 = vrot.slane %v3054_v15, %v1543_v23 }
 0x39b   : > { %1674 = vmatmul.mubr.bf16.gmra.mxu0 %v1516_v35  ;;  %v1514_v39 = vadd.f32 %v2994_v48, %v1493_v38 }
 0x39d   : > { %v1522_v41 = vpack.c.bf16 %v1514_v39, %v1513_v36 }
 0x39f   : > { %1734 = vmatmul.mubr.bf16.gmra.mxu1 %v1522_v41 }
 0x437   : > { %v3059_v47 = vpop.f32.mrf.mxu1 }
 0x439   : > { %v1687_v44 = vpop.f32.mrf.mxu1 }
 0x43a   : > { %v3062_v48 = vadd.f32 %v1687_v44, %v3057_v16 }
 0x43b   : > { %v3064_v46 = vpop.f32.mrf.mxu1 }
 0x43c   : > { %v2102_v40 = vmul.f32 -1.442695, %v3062_v48 }
 0x43d   : > { %v1691_v8 = vpop.f32.mrf.mxu1 }
 0x43e   : > { %2483 = vpow2.f32 %v2102_v40  ;;  %v3068_v19 = vadd.f32 %v1691_v8, %v3057_v16  ;;  %v1686_v8 = vadd.f32 %v3059_v47, %v3126_v31 }
 0x43f   : > { %v3070_v49 = vpop.f32.mrf.mxu1 }
 0x440   : > { %v2103_v50 = vmul.f32 -1.442695, %v3068_v19 }
 0x441   : > { %v1697_v51 = vpop.f32.mrf.mxu1 }
 0x442   : > { %2485 = vpow2.f32 %v2103_v50  ;;  %v3074_v52 = vadd.f32 %v1697_v51, %v3057_v16 }
 0x443   : > { %v3076_v54 = vpop.f32.mrf.mxu1 }
 0x444   : > { %v2104_v55 = vmul.f32 -1.442695, %v3074_v52 }
 0x445   : > { %v1701_v56 = vpop.f32.mrf.mxu1 }
 0x446   : > { %2487 = vpow2.f32 %v2104_v55  ;;  %v3080_v18 = vadd.f32 %v1701_v56, %v3057_v16  ;;  %v1690_v55 = vadd.f32 %v3064_v46, %v3126_v31 }
 0x447   : > { %v3082_v57 = vpop.f32.mrf.mxu1 }
 0x448   : > { %v2105_v59 = vmul.f32 -1.442695, %v3080_v18 }
 0x449   : > { %v1707_v60 = vpop.f32.mrf.mxu1 }
 0x44a   : > { %2489 = vpow2.f32 %v2105_v59  ;;  %v3086_v61 = vadd.f32 %v1707_v60, %v3057_v16 }
 0x44b   : > { %v2484_v62 = vpop.eup %2483  ;;  %v3088_v0 = vpop.f32.mrf.mxu1 }
 0x44c   : > { %v1796_v1 = vadd.f32 1.0, %v2484_v62  ;;  %v2106_v33 = vmul.f32 -1.442695, %v3086_v61 }
 0x44d   : > { %v1711_v20 = vpop.f32.mrf.mxu1 }
 0x44e   : > { %2491 = vrcp.f32 %v1796_v1  ;;  %v3092_v3 = vadd.f32 %v1711_v20, %v3057_v16 }
 0x44f   : > { %v2486_v53 = vpop.eup %2485  ;;  %2493 = vpow2.f32 %v2106_v33  ;;  %v3094_v25 = vpop.f32.mrf.mxu0 }
 0x450   : > { %v3096_v26 = vpop.f32.mrf.mxu1  ;;  %v1797_v4 = vadd.f32 1.0, %v2486_v53  ;;  %v2107_v5 = vmul.f32 -1.442695, %v3092_v3 }
 0x451   : > { %v1667_v6 = vpop.f32.mrf.mxu0 }
 0x452   : > { %v1717_v27 = vpop.f32.mrf.mxu1  ;;  %2495 = vrcp.f32 %v1797_v4  ;;  %v3100_v7 = vadd.f32 %v1667_v6, %v3057_v16 }
 0x453   : > { %v3103_v9 = vadd.f32 %v1717_v27, %v3057_v16  ;;  %v2488_v10 = vpop.eup %2487  ;;  %2497 = vpow2.f32 %v2107_v5  ;;  %v3105_v11 = vpop.f32.mrf.mxu0 }
 0x454   : > { %v3107_v12 = vpop.f32.mrf.mxu1  ;;  %v1798_v13 = vadd.f32 1.0, %v2488_v10  ;;  %v2098_v14 = vmul.f32 -1.442695, %v3100_v7 }
 0x455   : > { %v2108_v37 = vmul.f32 -1.442695, %v3103_v9  ;;  %v1671_v17 = vpop.f32.mrf.mxu0 }
 0x456   : > { %v1721_v58 = vpop.f32.mrf.mxu1  ;;  %2499 = vrcp.f32 %v1798_v13  ;;  %v3112_v30 = vadd.f32 %v1671_v17, %v3057_v16 }
 0x457   : > { %v3115_v21 = vadd.f32 %v1721_v58, %v3057_v16  ;;  %v2490_v22 = vpop.eup %2489  ;;  %2501 = vpow2.f32 %v2098_v14 }
 0x458   : > { %v3118_v2 = vpop.f32.mrf.mxu1  ;;  %v1799_v24 = vadd.f32 1.0, %v2490_v22  ;;  %2503 = vpow2.f32 %v2108_v37  ;;  %v2099_v28 = vmul.f32 -1.442695, %v3112_v30 }
 0x459   : > { %v2109_v29 = vmul.f32 -1.442695, %v3115_v21 }
 0x45a   : > { %v1727_v63 = vpop.f32.mrf.mxu1  ;;  %2505 = vrcp.f32 %v1799_v24  ;;  %v1696_v24 = vadd.f32 %v3070_v49, %v3126_v31 }
 0x45b   : > { %v3123_v34 = vadd.f32 %v1727_v63, %v3057_v16  ;;  %v2492_v45 = vpop.eup %2491  ;;  %2507 = vpow2.f32 %v2099_v28  ;;  %v3128_v32 = vpop.f32.mrf.mxu0 }
 0x45c   : > { %v3130_v35 = vpop.f32.mrf.mxu1  ;;  %v2494_v38 = vpop.eup %2493  ;;  %2509 = vpow2.f32 %v2109_v29  ;;  %v1844_v39 = vmul.f32 %v2492_v45, %v3062_v48  ;;  %v1700_v29 = vadd.f32 %v3076_v54, %v3126_v31 }
 0x45d   : > { %v2110_v36 = vmul.f32 -1.442695, %v3123_v34  ;;  %v1800_v41 = vadd.f32 1.0, %v2494_v38  ;;  %v1677_v42 = vpop.f32.mrf.mxu0 }
 0x45e   : > { %v1731_v43 = vpop.f32.mrf.mxu1  ;;  %v3136_v15 = vadd.f32 %v1677_v42, %v3057_v16  ;;  %v1860_v62 = vmul.f32 %v1844_v39, %v1686_v8 }
 0x45f   : > { %2511 = vpow2.f32 %v2110_v36  ;;  %v3139_v44 = vadd.f32 %v1731_v43, %v3057_v16  ;;  %v2496_v40 = vpop.eup %2495  ;;  %v3143_v50 = vpop.f32.mrf.mxu0 }
 0x460   : > { %2513 = vrcp.f32 %v1800_v41  ;;  %v3145_v51 = vpop.f32.mrf.mxu1  ;;  %v2498_v48 = vpop.eup %2497  ;;  %v1845_v56 = vmul.f32 %v2496_v40, %v3068_v19  ;;  %v2100_v59 = vmul.f32 -1.442695, %v3136_v15 }
 0x461   : > { %v2111_v60 = vmul.f32 -1.442695, %v3139_v44  ;;  %v1801_v1 = vadd.f32 1.0, %v2498_v48  ;;  %v1681_v47 = vpop.f32.mrf.mxu0 }
 0x462   : > { %v1737_v33 = vpop.f32.mrf.mxu1  ;;  %v1861_v20 = vmul.f32 %v1845_v56, %v1690_v55  ;;  %2515 = vpow2.f32 %v2100_v59  ;;  %v3155_v53 = vadd.f32 %v1681_v47, %v3057_v16  ;;  %v1706_v55 = vadd.f32 %v3082_v57, %v3126_v31 }
 0x463   : > { %v3158_v4 = vadd.f32 %v1737_v33, %v3057_v16  ;;  %v2500_v46 = vpop.eup %2499  ;;  %2517 = vrcp.f32 %v1801_v1  ;;  %v1710_v56 = vadd.f32 %v3088_v0, %v3126_v31 }
 0x464   : > { %v3160_v5 = vpop.f32.mrf.mxu1  ;;  %v2502_v19 = vpop.eup %2501  ;;  %v2165_v6 = vpack.c.bf16 %v1861_v20, %v1860_v62  ;;  %2519 = vpow2.f32 %v2111_v60  ;;  %v2101_v27 = vmul.f32 -1.442695, %v3155_v53  ;;  %v1846_v17 = vmul.f32 %v2500_v46, %v3074_v52 }
 0x465   : > { %v2504_v10 = vpop.eup %2503  ;;  %v1792_v13 = vadd.f32 1.0, %v2502_v19  ;;  %v2112_v14 = vmul.f32 -1.442695, %v3158_v4 }
 0x466   : > { %v1741_v37 = vpop.f32.mrf.mxu1  ;;  %2193 = vst [vmem:[%s3164_s29 + $0x10] sm:$0xff] %v2165_v6   ;;  %v1802_v58 = vadd.f32 1.0, %v2504_v10  ;;  %2521 = vpow2.f32 %v2101_v27 }
 0x467   : > { %v3169_v22 = vadd.f32 %v1741_v37, %v3057_v16  ;;  %v2506_v23 = vpop.eup %2505  ;;  %2523 = vrcp.f32 %v1792_v13  ;;  %v1862_v16 = vmul.f32 %v1846_v17, %v1696_v24  ;;  %v1670_v37 = vadd.f32 %v3105_v11, %v3126_v31 }
 0x468   : > { %v2508_v28 = vpop.eup %2507  ;;  %v1847_v63 = vmul.f32 %v2506_v23, %v3080_v18  ;;  %2525 = vrcp.f32 %v1802_v58  ;;  %v1720_v58 = vadd.f32 %v3107_v12, %v3126_v31  ;;  %v1730_v12 = vadd.f32 %v3130_v35, %v3126_v31 }
 0x469   : > { %v2113_v52 = vmul.f32 -1.442695, %v3169_v22  ;;  %v2510_v45 = vpop.eup %2509  ;;  %v1793_v38 = vadd.f32 1.0, %v2508_v28  ;;  %2527 = vpow2.f32 %v2112_v14  ;;  %v1666_v14 = vadd.f32 %v3094_v25, %v3126_v31 }
 0x46a   : > { %v1863_v36 = vmul.f32 %v1847_v63, %v1700_v29  ;;  %v1803_v39 = vadd.f32 1.0, %v2510_v45 }
 0x46b   : > { %2529 = vpow2.f32 %v2113_v52 }
 0x46c   : > { %v2512_v41 = vpop.eup %2511  ;;  %2531 = vrcp.f32 %v1793_v38  ;;  %v2170_v42 = vpack.c.bf16 %v1863_v36, %v1862_v16  ;;  %v1676_v36 = vadd.f32 %v3128_v32, %v3126_v31  ;;  %v1736_v32 = vadd.f32 %v3145_v51, %v3126_v31 }
 0x46d   : > { %v2514_v49 = vpop.eup %2513  ;;  %2533 = vrcp.f32 %v1803_v39  ;;  %v1804_v43 = vadd.f32 1.0, %v2512_v41 }
 0x46e   : > { %2194 = vst [vmem:[%s3164_s29 + $0x18] sm:$0xff] %v2170_v42   ;;  %v1848_v18 = vmul.f32 %v2514_v49, %v3086_v61 }
 0x46f   : > { %v2516_v54 = vpop.eup %2515  ;;  %2535 = vrcp.f32 %v1804_v43 }
 0x470   : > { %v2518_v40 = vpop.eup %2517  ;;  %v1794_v8 = vadd.f32 1.0, %v2516_v54  ;;  %v1864_v1 = vmul.f32 %v1848_v18, %v1706_v55 }
 0x471   : > { %v2520_v48 = vpop.eup %2519  ;;  %v1849_v59 = vmul.f32 %v2518_v40, %v3092_v3 }
 0x472   : > { %2537 = vrcp.f32 %v1794_v8  ;;  %v1805_v60 = vadd.f32 1.0, %v2520_v48 }
 0x473   : > { %v2522_v62 = vpop.eup %2521  ;;  %v1865_v47 = vmul.f32 %v1849_v59, %v1710_v56 }
 0x474   : > { %v2524_v33 = vpop.eup %2523  ;;  %2539 = vrcp.f32 %v1805_v60  ;;  %v1795_v61 = vadd.f32 1.0, %v2522_v62 }
 0x475   : > { %v2526_v20 = vpop.eup %2525  ;;  %v2175_v46 = vpack.c.bf16 %v1865_v47, %v1864_v1  ;;  %v1840_v57 = vmul.f32 %v2524_v33, %v3100_v7  ;;  %v1716_v7 = vadd.f32 %v3096_v26, %v3126_v31  ;;  %v1726_v26 = vadd.f32 %v3118_v2, %v3126_v31 }
 0x476   : > { %v2528_v19 = vpop.eup %2527  ;;  %2541 = vrcp.f32 %v1795_v61  ;;  %v1850_v3 = vmul.f32 %v2526_v20, %v3103_v9  ;;  %v1680_v2 = vadd.f32 %v3143_v50, %v3126_v31  ;;  %v1740_v50 = vadd.f32 %v3160_v5, %v3126_v31 }
 0x477   : > { %2195 = vst [vmem:[%s3164_s29 + $0x20] sm:$0xff] %v2175_v46   ;;  %v1806_v27 = vadd.f32 1.0, %v2528_v19  ;;  %v1856_v23 = vmul.f32 %v1840_v57, %v1666_v14 }
 0x478   : > { %v2530_v6 = vpop.eup %2529  ;;  %v1866_v25 = vmul.f32 %v1850_v3, %v1716_v7 }
 0x479   : > { %v2532_v0 = vpop.eup %2531  ;;  %v1807_v10 = vadd.f32 1.0, %v2530_v6  ;;  %2543 = vrcp.f32 %v1806_v27 }
 0x47a   : > { %v2534_v13 = vpop.eup %2533  ;;  %v1841_v17 = vmul.f32 %v2532_v0, %v3112_v30 }
 0x47b   : > { %v1851_v9 = vmul.f32 %v2534_v13, %v3115_v21  ;;  %2545 = vrcp.f32 %v1807_v10 }
 0x47c   : > { %v1857_v24 = vmul.f32 %v1841_v17, %v1670_v37  ;;  %v2536_v29 = vpop.eup %2535 }
 0x47d   : > { %v1867_v28 = vmul.f32 %v1851_v9, %v1720_v58  ;;  %v1852_v30 = vmul.f32 %v2536_v29, %v3123_v34 }
 0x47e   : > { %v2155_v63 = vpack.c.bf16 %v1857_v24, %v1856_v23 }
 0x47f   : > { %v2180_v11 = vpack.c.bf16 %v1867_v28, %v1866_v25  ;;  %v2538_v52 = vpop.eup %2537  ;;  %v1868_v39 = vmul.f32 %v1852_v30, %v1726_v26 }
 0x480   : > { %2156 = vst [vmem:[%s3164_s29] sm:$0xff] %v2155_v63   ;;  %v1842_v21 = vmul.f32 %v2538_v52, %v3136_v15 }
 0x481   : > { %2196 = vst [vmem:[%s3164_s29 + $0x28] sm:$0xff] %v2180_v11   ;;  %v2540_v45 = vpop.eup %2539 }
 0x482   : > { %v1853_v38 = vmul.f32 %v2540_v45, %v3139_v44  ;;  %v1858_v35 = vmul.f32 %v1842_v21, %v1676_v36 }
 0x483   : > { %v2542_v16 = vpop.eup %2541 }
 0x484   : > { %v1869_v34 = vmul.f32 %v1853_v38, %v1730_v12  ;;  %v1843_v41 = vmul.f32 %v2542_v16, %v3155_v53 }
 0x486   : > { %v2544_v49 = vpop.eup %2543  ;;  %v2185_v42 = vpack.c.bf16 %v1869_v34, %v1868_v39  ;;  %v1859_v15 = vmul.f32 %v1843_v41, %v1680_v2 }
 0x487   : > { %v1854_v43 = vmul.f32 %v2544_v49, %v3158_v4 }
 0x488   : > { %v2546_v44 = vpop.eup %2545  ;;  %2197 = vst [vmem:[%s3164_s29 + $0x30] sm:$0xff] %v2185_v42   ;;  %v2160_v54 = vpack.c.bf16 %v1859_v15, %v1858_v35 }
 0x489   : > { %v1855_v53 = vmul.f32 %v2546_v44, %v3169_v22  ;;  %v1870_v18 = vmul.f32 %v1854_v43, %v1736_v32 }
 0x48a   : > { %2192 = vst [vmem:[%s3164_s29 + $0x8] sm:$0xff] %v2160_v54  }
 0x48b   : > { %v1871_v40 = vmul.f32 %v1855_v53, %v1740_v50 }
 0x48d   : > { %v2190_v51 = vpack.c.bf16 %v1871_v40, %v1870_v18 }
 0x48f   : > { %2198 = vst [vmem:[%s3164_s29 + $0x38] sm:$0xff] %v2190_v51  }
 0x490   : > { %2560 = shalt.err (!%p2557_p3)
}
 0x491   : > { %s2561_s20 = scalar_lea.hbm %s3224_s15, 1024  ;;  %s2565_s23 = scalar_lea.hbm %s3278_s7, 2048 }
 0x492   : > { %p2562_p4 = scmp.ne.s32.totalorder %s3224_s15, %s2561_s20  ;;  %p2566_p9 = scmp.lt.s32.totalorder %s3224_s15, %s3278_s7 }
 0x493   : > { %p2567_p10 = scmp.lt.s32.totalorder %s2565_s23, %s2561_s20 }
 0x494   : > { %p2563_p7 = pnand %p2562_p4, %p2692_p5 }
 0x495   : > { %p2568_p11 = por %p2567_p10, %p2566_p9 }
 0x496   : > { %p2564_p8 = pneg %p2563_p7 }
 0x498   : > { %p2569_p12 = pnand %p2568_p11, %p2564_p8 }
 0x49a   : > { %2572 = shalt.err (!%p2569_p12)
}
 0x49b   : > { %s2612_s13 = smov 64   ;;  %s2613_s14 = smov 4  }
 0x49c   : > { %2294 = dma.vmem_to_hbm [thread:$0]  (%p2692_p5), %s3226_s9, 1024, %s3224_s15, %s3231_s16, %s2612_s13, %s2612_s13, %s2613_s14  }
 0x49d PF: > { %p2300_p13 = scmp.ge.s32.totalorder %s2607_s27, 2  ;;  %s1981_s28 = sand.u32 1, %s2595_s24  }
 0x49e   : > { %s1982_s17 = scalar_lea.sflag [#allocation3], %s1981_s28 }
 0x49f   : > { %p2297_p0 = pnand %p2300_p13, %p2696_p6 }
 0x4a1   : > { %p2298_p1 = pneg %p2297_p0 }
 0x4a3   : > { %2590 = dma.done.wait (%p2298_p1), %s1982_s17, 1024  }
 0x4a4   : > { %2592 = vsyncadd (%p2298_p1), %s1982_s17, 4294966272  ;;  %p17_p2 = scmp.ge.s32.totalorder %s2679_s30, 4   ;;  %s3281_s24 = smov %s2599_s25 }
 0x4a5   : > { %s3282_s25 = smov %s2603_s26  ;;  %s3283_s26 = smov %s2690_s10 }
 0x4a6   : > { %s3284_s27 = smov %s2679_s30  ;;  %19 = sbr.rel (!%p17_p2) target bundleno = 3 (0x3), region = 83 }
 0x4ab   :  { %1987 = vsyncpa [#allocation3], 1 }
 0x4ac   :  { %1989 = vsyncpa [#allocation3 + $0x1], 1 }

</bundles_post_ra>
